<compile_context>
chip_gen: v7x
topology: tpu7x:2x2x1
jax: 0.10.0
libtpu: 0.0.40
codegen_flags: <defaults>
</compile_context>

<pallas_src>
import functools
import math

import numpy as np

import jax
import jax.numpy as jnp
from jax.experimental import pallas as pl
from jax.experimental.pallas import tpu as pltpu

_LANE = 128
_SUBLANE = 8
_COMPUTE_DTYPE = jnp.bfloat16     # MXU operand dtype; accumulation is always f32


def _pick_vmem_limit():
    # v7x has 64 MiB physical VMEM per TC, v5e/v6e have 128 MiB; leave headroom.
    try:
        cap = getattr(pltpu.get_tpu_info(), "vmem_capacity_bytes", None)
        if cap:
            return int(min(cap * 3 // 4, 96 * 1024 * 1024))
    except Exception:
        pass
    return 48 * 1024 * 1024


_VMEM_LIMIT = _pick_vmem_limit()


def _round_up(x, m):
    return ((x + m - 1) // m) * m


def _gelu(x):
    # TODO(synk): nn.GELU defaults to the exact erf form; the tanh approximation
    # (same formula in kernel and reference) is used as a guaranteed Mosaic/EUP
    # lowering, ~1e-3 max deviation from erf.
    c = math.sqrt(2.0 / math.pi)
    return 0.5 * x * (1.0 + jnp.tanh(c * (x + 0.044715 * x * x * x)))


# ---------------------------------------------------------------------------
# Fused [LayerNorm] + matmul + bias [+ GELU] [+ residual] kernel
# ---------------------------------------------------------------------------

def _ln_linear_kernel(*args, activation, eps, fuse_ln, fuse_res):
    idx = 0
    x_ref = args[idx]; idx += 1
    if fuse_ln:
        g_ref = args[idx]; bln_ref = args[idx + 1]; idx += 2
    w_ref = args[idx]; b_ref = args[idx + 1]; idx += 2
    if fuse_res:
        res_ref = args[idx]; idx += 1
    o_ref = args[idx]

    x = x_ref[...].astype(jnp.float32)
    if fuse_ln:
        mean = jnp.mean(x, axis=-1, keepdims=True)
        xc = x - mean
        var = jnp.mean(xc * xc, axis=-1, keepdims=True)
        x = xc * jax.lax.rsqrt(var + eps) * g_ref[...] + bln_ref[...]
    acc = jnp.dot(x.astype(w_ref.dtype), w_ref[...],
                  preferred_element_type=jnp.float32)
    acc = acc + b_ref[...]
    if activation == "gelu":
        acc = _gelu(acc)
    if fuse_res:
        acc = acc + res_ref[...].astype(jnp.float32)
    o_ref[...] = acc.astype(o_ref.dtype)


def ln_linear_pallas(x, w, b, *, ln_g=None, ln_b=None, residual=None,
                     activation=None, eps=1e-5, block_m=512):
    """y = act(LN(x) @ w + b) + residual   (LN / act / residual optional).

    x: [M, K] f32, w: [K, E] (cast to bf16 MXU operands), b: [E] -> y: [M, E] f32.
    """
    M, K = x.shape
    E = w.shape[1]
    fuse_ln = ln_g is not None
    fuse_res = residual is not None
    out_dtype = x.dtype

    w = w.astype(_COMPUTE_DTYPE)

    # Lane-dense output: pad E to a multiple of 128 -> unmasked full-vreg stores.
    e_pad = _round_up(E, _LANE)
    if e_pad != E:
        w = jnp.pad(w, ((0, 0), (0, e_pad - E)))
        b = jnp.pad(b, (0, e_pad - E))
    b2 = b.reshape(1, e_pad).astype(jnp.float32)

    # Tile E only if the resident weight block would not fit the VMEM budget
    # (v7x concern); te must be a multiple of 128 dividing e_pad.
    te = e_pad
    w_budget = _VMEM_LIMIT // 3
    while te > _LANE and 2 * K * te * w.dtype.itemsize > w_budget:
        half = te // 2
        if half % _LANE == 0 and e_pad % half == 0:
            te = half
        else:
            break

    # Tile M; keep >=2 grid steps when possible so both v7x TensorCores get work.
    m8 = _round_up(M, _SUBLANE)
    tm = min(block_m, m8)
    if m8 > _SUBLANE and m8 // tm < 2:
        tm = _round_up((m8 + 1) // 2, _SUBLANE)

    # Shrink tm until double-buffered activation tiles fit the VMEM budget.
    def _tile_bytes(t):
        byt = 2 * t * K * x.dtype.itemsize + 2 * t * te * 4
        if fuse_res:
            byt += 2 * t * te * 4
        return byt

    act_budget = _VMEM_LIMIT - 2 * K * te * w.dtype.itemsize - 2 * te * 4
    while tm > _SUBLANE and _tile_bytes(tm) > max(act_budget, _VMEM_LIMIT // 4):
        tm = _round_up(tm // 2, _SUBLANE)

    m_pad = _round_up(M, tm)
    if m_pad != M:
        x = jnp.pad(x, ((0, m_pad - M), (0, 0)))

    inputs = [x]
    in_specs = [pl.BlockSpec((tm, K), lambda i, j: (i, 0))]
    if fuse_ln:
        inputs += [ln_g.reshape(1, K).astype(jnp.float32),
                   ln_b.reshape(1, K).astype(jnp.float32)]
        in_specs += [pl.BlockSpec((1, K), lambda i, j: (0, 0)),
                     pl.BlockSpec((1, K), lambda i, j: (0, 0))]
    inputs += [w, b2]
    in_specs += [pl.BlockSpec((K, te), lambda i, j: (0, j)),
                 pl.BlockSpec((1, te), lambda i, j: (0, j))]
    if fuse_res:
        res = residual.astype(jnp.float32)
        res = jnp.pad(res, ((0, m_pad - M), (0, e_pad - E)))
        inputs.append(res)
        in_specs.append(pl.BlockSpec((tm, te), lambda i, j: (i, j)))

    cost = pl.CostEstimate(
        flops=2 * m_pad * K * e_pad,
        transcendentals=m_pad * e_pad if activation == "gelu" else 0,
        bytes_accessed=(x.dtype.itemsize * m_pad * K
                        + w.dtype.itemsize * K * e_pad
                        + 4 * m_pad * e_pad * (2 if fuse_res else 1)),
    )

    out = pl.pallas_call(
        functools.partial(_ln_linear_kernel, activation=activation, eps=eps,
                          fuse_ln=fuse_ln, fuse_res=fuse_res),
        out_shape=jax.ShapeDtypeStruct((m_pad, e_pad), out_dtype),
        grid_spec=pl.GridSpec(
            grid=(m_pad // tm, e_pad // te),
            in_specs=in_specs,
            out_specs=pl.BlockSpec((tm, te), lambda i, j: (i, j)),
        ),
        compiler_params=pltpu.CompilerParams(
            dimension_semantics=("parallel", "parallel"),
            vmem_limit_bytes=_VMEM_LIMIT,
        ),
        cost_estimate=cost,
    )(*inputs)
    return out[:M, :E]


# ---------------------------------------------------------------------------
# Standalone LayerNorm (only needed when H/W require spatial padding)
# ---------------------------------------------------------------------------

def _layernorm_kernel(x_ref, g_ref, b_ref, o_ref, *, eps):
    x = x_ref[...].astype(jnp.float32)
    mean = jnp.mean(x, axis=-1, keepdims=True)
    xc = x - mean
    var = jnp.mean(xc * xc, axis=-1, keepdims=True)
    y = xc * jax.lax.rsqrt(var + eps) * g_ref[...] + b_ref[...]
    o_ref[...] = y.astype(o_ref.dtype)


def layernorm_pallas(x, gamma, beta, *, eps=1e-5, block_m=1024):
    M, C = x.shape
    m8 = _round_up(M, _SUBLANE)
    tm = min(block_m, m8)
    if m8 > _SUBLANE and m8 // tm < 2:
        tm = _round_up((m8 + 1) // 2, _SUBLANE)
    m_pad = _round_up(M, tm)
    if m_pad != M:
        x = jnp.pad(x, ((0, m_pad - M), (0, 0)))
    g2 = gamma.reshape(1, C).astype(jnp.float32)
    b2 = beta.reshape(1, C).astype(jnp.float32)

    out = pl.pallas_call(
        functools.partial(_layernorm_kernel, eps=eps),
        out_shape=jax.ShapeDtypeStruct((m_pad, C), x.dtype),
        grid_spec=pl.GridSpec(
            grid=(m_pad // tm,),
            in_specs=[pl.BlockSpec((tm, C), lambda i: (i, 0)),
                      pl.BlockSpec((1, C), lambda i: (0, 0)),
                      pl.BlockSpec((1, C), lambda i: (0, 0))],
            out_specs=pl.BlockSpec((tm, C), lambda i: (i, 0)),
        ),
        compiler_params=pltpu.CompilerParams(
            dimension_semantics=("parallel",),
            vmem_limit_bytes=_VMEM_LIMIT,
        ),
    )(x, g2, b2)
    return out[:M]


# ---------------------------------------------------------------------------
# Window attention kernel (per-window, all heads in the lane axis)
# ---------------------------------------------------------------------------

def _window_attn_kernel(*args, num_heads, head_dim, scale, has_mask):
    qkv_ref = args[0]
    bias_ref = args[1]
    mask_ref = args[2] if has_mask else None
    o_ref = args[-1]

    qkv = qkv_ref[...].astype(jnp.float32)          # (tw, N, 3C)
    bias = bias_ref[...].astype(jnp.float32)        # (h, N, N)  (grid-invariant)
    mask = mask_ref[...].astype(jnp.float32) if has_mask else None

    C = num_heads * head_dim
    outs = []
    for h in range(num_heads):
        lo = h * head_dim
        q = qkv[:, :, lo:lo + head_dim] * scale
        k = qkv[:, :, C + lo:C + lo + head_dim]
        v = qkv[:, :, 2 * C + lo:2 * C + lo + head_dim]
        s = jnp.einsum("wqd,wkd->wqk",
                       q.astype(_COMPUTE_DTYPE), k.astype(_COMPUTE_DTYPE),
                       preferred_element_type=jnp.float32)
        s = s + bias[h:h + 1]
        if has_mask:
            s = s + mask
        s = s - jnp.max(s, axis=-1, keepdims=True)
        p = jnp.exp(s)
        l = jnp.sum(p, axis=-1, keepdims=True)
        o_h = jnp.einsum("wqk,wkd->wqd",
                         p.astype(_COMPUTE_DTYPE), v.astype(_COMPUTE_DTYPE),
                         preferred_element_type=jnp.float32)
        # Normalize the (N, d) output instead of the (N, N) probabilities.
        outs.append(o_h / l)
    # Single lane-dense store in the (Bw, N, h*d)=(Bw*N, C) layout proj consumes.
    o_ref[...] = jnp.concatenate(outs, axis=-1).astype(o_ref.dtype)


def _divisor_tile(n, cap):
    best = 1
    for t in range(1, min(n, cap) + 1):
        if n % t == 0:
            best = t
    return best


def window_attention_pallas(qkv, rel_bias, mask, scale, *, num_heads, nW,
                            block_w=8):
    """Windowed MHSA.  qkv: [Bw, N, 3C] -> [Bw, N, C].

    rel_bias: [h, N, N]; mask: [nW, N, N] or None (windows are batch-major, so
    window w uses mask row w % nW).
    """
    Bw, N, C3 = qkv.shape
    C = C3 // 3
    head_dim = C // num_heads

    # Window tile must divide nW so the mask block index is simply i % n_mb.
    tw = _divisor_tile(nW, block_w)
    while tw > 1 and Bw // tw < 2:
        tw = _divisor_tile(nW, tw - 1)    # keep >=2 parallel steps (v7x megacore)

    has_mask = mask is not None
    inputs = [qkv, rel_bias.astype(jnp.float32)]
    in_specs = [pl.BlockSpec((tw, N, C3), lambda i: (i, 0, 0)),
                pl.BlockSpec((num_heads, N, N), lambda i: (0, 0, 0))]
    if has_mask:
        n_mb = nW // tw
        inputs.append(mask.astype(jnp.float32))
        in_specs.append(pl.BlockSpec((tw, N, N), lambda i: (i % n_mb, 0, 0)))

    out = pl.pallas_call(
        functools.partial(_window_attn_kernel, num_heads=num_heads,
                          head_dim=head_dim, scale=scale, has_mask=has_mask),
        out_shape=jax.ShapeDtypeStruct((Bw, N, C), qkv.dtype),
        grid_spec=pl.GridSpec(
            grid=(Bw // tw,),
            in_specs=in_specs,
            out_specs=pl.BlockSpec((tw, N, C), lambda i: (i, 0, 0)),
        ),
        compiler_params=pltpu.CompilerParams(
            dimension_semantics=("parallel",),
            vmem_limit_bytes=_VMEM_LIMIT,
        ),
    )(*inputs)
    return out


# ---------------------------------------------------------------------------
# Pure-JAX reference ops (identical math incl. bf16 operand casts)
# ---------------------------------------------------------------------------

def _ln_linear_ref(x, w, b, *, ln_g=None, ln_b=None, residual=None,
                   activation=None, eps=1e-5, **_):
    x = x.astype(jnp.float32)
    if ln_g is not None:
        mean = jnp.mean(x, axis=-1, keepdims=True)
        xc = x - mean
        var = jnp.mean(xc * xc, axis=-1, keepdims=True)
        x = xc * jax.lax.rsqrt(var + eps) * ln_g + ln_b
    y = jnp.dot(x.astype(_COMPUTE_DTYPE), w.astype(_COMPUTE_DTYPE),
                preferred_element_type=jnp.float32) + b.astype(jnp.float32)
    if activation == "gelu":
        y = _gelu(y)
    if residual is not None:
        y = y + residual.astype(jnp.float32)
    return y


def _layernorm_ref(x, gamma, beta, eps=1e-5):
    x = x.astype(jnp.float32)
    mean = jnp.mean(x, axis=-1, keepdims=True)
    xc = x - mean
    var = jnp.mean(xc * xc, axis=-1, keepdims=True)
    return xc * jax.lax.rsqrt(var + eps) * gamma + beta


def _window_attn_ref(qkv, rel_bias, mask, scale, *, num_heads, nW, **_):
    Bw, N, C3 = qkv.shape
    C = C3 // 3
    d = C // num_heads
    outs = []
    for h in range(num_heads):
        lo = h * d
        q = qkv[:, :, lo:lo + d].astype(jnp.float32) * scale
        k = qkv[:, :, C + lo:C + lo + d].astype(jnp.float32)
        v = qkv[:, :, 2 * C + lo:2 * C + lo + d].astype(jnp.float32)
        s = jnp.einsum("wqd,wkd->wqk", q.astype(_COMPUTE_DTYPE),
                       k.astype(_COMPUTE_DTYPE),
                       preferred_element_type=jnp.float32)
        s = s + rel_bias[h].astype(jnp.float32)[None]
        if mask is not None:
            s = s + jnp.tile(mask.astype(jnp.float32), (Bw // nW, 1, 1))
        s = s - jnp.max(s, axis=-1, keepdims=True)
        p = jnp.exp(s)
        l = jnp.sum(p, axis=-1, keepdims=True)
        o_h = jnp.einsum("wqk,wkd->wqd", p.astype(_COMPUTE_DTYPE),
                         v.astype(_COMPUTE_DTYPE),
                         preferred_element_type=jnp.float32)
        outs.append(o_h / l)
    return jnp.concatenate(outs, axis=-1)


# ---------------------------------------------------------------------------
# Swin glue (window partition / reverse, masks, relative-position index)
# ---------------------------------------------------------------------------

def window_partition(x, ws):
    B, H, W, C = x.shape
    x = x.reshape(B, H // ws, ws, W // ws, ws, C)
    return jnp.transpose(x, (0, 1, 3, 2, 4, 5)).reshape(-1, ws, ws, C)


def window_reverse(windows, ws, H, W):
    B = windows.shape[0] // ((H // ws) * (W // ws))
    x = windows.reshape(B, H // ws, W // ws, ws, ws, -1)
    return jnp.transpose(x, (0, 1, 3, 2, 4, 5)).reshape(B, H, W, -1)


def _create_attn_mask(H, W, ws, shift):
    """BasicLayer.create_mask, computed statically in numpy."""
    Hp = int(np.ceil(H / ws)) * ws
    Wp = int(np.ceil(W / ws)) * ws
    img_mask = np.zeros((1, Hp, Wp, 1), np.float32)
    slices = (slice(0, -ws), slice(-ws, -shift), slice(-shift, None))
    cnt = 0
    for hs in slices:
        for wsl in slices:
            img_mask[:, hs, wsl, :] = cnt
            cnt += 1
    m = img_mask.reshape(1, Hp // ws, ws, Wp // ws, ws, 1)
    m = m.transpose(0, 1, 3, 2, 4, 5).reshape(-1, ws * ws)
    attn_mask = m[:, None, :] - m[:, :, None]
    attn_mask = np.where(attn_mask != 0, -100.0, 0.0).astype(np.float32)
    return jnp.asarray(attn_mask)                         # (nW, N, N)


def _relative_position_index(ws):
    """Matches WindowAttention.double_step_seq(...) + flip(1)."""
    seq1 = np.arange(ws) * (2 * ws - 1)
    seq2 = np.arange(ws)
    coords = (seq1[:, None] + seq2[None, :]).reshape(1, -1)   # (1, N)
    rel = coords + coords.T                                    # (N, N)
    rel = rel[:, ::-1].copy()                                  # flip along dim 1
    return rel.astype(np.int32)


# ---------------------------------------------------------------------------
# SwinTransformerBlock / BasicLayer forward
# ---------------------------------------------------------------------------

def _swin_block_forward(x, H, W, p, *, shift, ws, num_heads, attn_mask,
                        rel_index, use_pallas):
    B, L, C = x.shape
    assert L == H * W, "input feature has wrong size"
    lin = ln_linear_pallas if use_pallas else _ln_linear_ref
    ln = layernorm_pallas if use_pallas else _layernorm_ref
    attn = window_attention_pallas if use_pallas else _window_attn_ref

    head_dim = C // num_heads
    scale = head_dim ** (-0.5)
    shortcut = x

    pad_b = (-H) % ws
    pad_r = (-W) % ws
    fuse_ln1 = (pad_b == 0 and pad_r == 0)

    if fuse_ln1:
        xs = x.reshape(B, H, W, C)
    else:
        # TODO(synk): with spatial padding the zero pad rows must stay zero after
        # norm1 (they feed K/V of boundary windows), so norm1 cannot be fused into
        # the qkv matmul -- run the standalone LN kernel first.
        xs = ln(x.reshape(B * L, C), p["norm1_g"], p["norm1_b"]).reshape(B, H, W, C)
        xs = jnp.pad(xs, ((0, 0), (0, pad_b), (0, pad_r), (0, 0)))
    Hp, Wp = H + pad_b, W + pad_r

    if shift > 0:
        xs = jnp.roll(xs, shift=(-shift, -shift), axis=(1, 2))

    N = ws * ws
    xw = window_partition(xs, ws).reshape(-1, N, C)        # (Bw, N, C)
    Bw = xw.shape[0]
    nW = (Hp // ws) * (Wp // ws)

    # norm1 + qkv projection fused (LN commutes with the roll/window permutation).
    qkv = lin(xw.reshape(Bw * N, C), p["qkv_w"], p["qkv_b"],
              ln_g=p["norm1_g"] if fuse_ln1 else None,
              ln_b=p["norm1_b"] if fuse_ln1 else None)
    qkv = qkv.reshape(Bw, N, 3 * C)                         # no (2,0,3,1,4) transpose

    # relative position bias (h, N, N) -- tiny, computed in glue
    rel_bias = p["rel_bias_table"][rel_index.reshape(-1)].reshape(N, N, num_heads)
    rel_bias = jnp.transpose(rel_bias, (2, 0, 1))

    mask = attn_mask if shift > 0 else None                 # skip zero-mask entirely
    o = attn(qkv, rel_bias, mask, scale, num_heads=num_heads, nW=nW)   # (Bw, N, C)

    # attention output projection (attention output already in (Bw*N, C) layout)
    o = lin(o.reshape(Bw * N, C), p["proj_w"], p["proj_b"]).reshape(Bw, ws, ws, C)

    xr = window_reverse(o, ws, Hp, Wp)
    if shift > 0:
        xr = jnp.roll(xr, shift=(shift, shift), axis=(1, 2))
    if pad_b or pad_r:
        xr = xr[:, :H, :W, :]
    # TODO(synk): proj residual not fused into its matmul -- the window layout of
    # the proj output differs from the token layout of `shortcut`.
    x = shortcut + xr.reshape(B, L, C)                      # drop_path = Identity

    # MLP branch: norm2+fc1(+GELU) fused, fc2 + residual add fused.
    x2d = x.reshape(B * L, C)
    y = lin(x2d, p["fc1_w"], p["fc1_b"],
            ln_g=p["norm2_g"], ln_b=p["norm2_b"], activation="gelu")
    x = lin(y, p["fc2_w"], p["fc2_b"], residual=x2d).reshape(B, L, C)
    return x


class BasicLayerPallas:
    """JAX/Pallas equivalent of BasicLayer (standard Swin path, downsample=None)."""

    def __init__(self, dim, depth, num_heads, window_size, mlp_ratio=4.0, key=None):
        self.dim = dim
        self.depth = depth
        self.num_heads = num_heads
        self.window_size = window_size
        self.shift_size = window_size // 2
        hidden = int(dim * mlp_ratio)
        self.rel_index = _relative_position_index(window_size)

        if key is None:
            key = jax.random.PRNGKey(0)

        def linear_init(k, fan_in, fan_out):
            kw, kb = jax.random.split(k)
            bound = 1.0 / math.sqrt(fan_in)
            w = jax.random.uniform(kw, (fan_in, fan_out), minval=-bound,
                                   maxval=bound, dtype=jnp.float32)
            bb = jax.random.uniform(kb, (fan_out,), minval=-bound,
                                    maxval=bound, dtype=jnp.float32)
            # Weights pre-cast once to the MXU operand dtype (bf16); biases f32.
            return w.astype(_COMPUTE_DTYPE), bb

        n_table = (2 * window_size - 1) ** 2
        self.blocks = []
        keys = jax.random.split(key, depth)
        for i in range(depth):
            ks = jax.random.split(keys[i], 9)
            qkv_w, qkv_b = linear_init(ks[0], dim, 3 * dim)
            proj_w, proj_b = linear_init(ks[1], dim, dim)
            fc1_w, fc1_b = linear_init(ks[2], dim, hidden)
            fc2_w, fc2_b = linear_init(ks[3], hidden, dim)
            # LayerNorm affines randomized (instead of ones/zeros) so the
            # correctness check actually exercises them.
            p = dict(
                norm1_g=1.0 + 0.1 * jax.random.normal(ks[4], (dim,), jnp.float32),
                norm1_b=0.1 * jax.random.normal(ks[5], (dim,), jnp.float32),
                norm2_g=1.0 + 0.1 * jax.random.normal(ks[6], (dim,), jnp.float32),
                norm2_b=0.1 * jax.random.normal(ks[7], (dim,), jnp.float32),
                qkv_w=qkv_w, qkv_b=qkv_b, proj_w=proj_w, proj_b=proj_b,
                fc1_w=fc1_w, fc1_b=fc1_b, fc2_w=fc2_w, fc2_b=fc2_b,
                rel_bias_table=0.02 * jax.random.normal(
                    ks[8], (n_table, num_heads), jnp.float32),
            )
            self.blocks.append(p)

    def __call__(self, x, H, W, use_pallas=True):
        attn_mask = _create_attn_mask(H, W, self.window_size, self.shift_size)
        for i, p in enumerate(self.blocks):
            shift = 0 if i % 2 == 0 else self.shift_size
            x = _swin_block_forward(
                x, H, W, p, shift=shift, ws=self.window_size,
                num_heads=self.num_heads, attn_mask=attn_mask,
                rel_index=self.rel_index, use_pallas=use_pallas)
        # downsample=None in this configuration -> (x, H, W, x)
        return x, H, W, x


if __name__ == "__main__":
    key = jax.random.PRNGKey(0)
    k_x, k_p = jax.random.split(key)

    # Small shapes consistent with the module: batch=2, dim=32, 8x8 tokens,
    # window_size=4, depth=2 (one regular + one shifted/masked block), 4 heads.
    B, H, W = 2, 8, 8
    dim, depth, num_heads, window_size = 32, 2, 4, 4
    L = H * W

    x = jax.random.normal(k_x, (B, L, dim), dtype=jnp.float32)
    layer = BasicLayerPallas(dim=dim, depth=depth, num_heads=num_heads,
                             window_size=window_size, mlp_ratio=4.0, key=k_p)

    out, Ho, Wo, out_dup = layer(x, H, W, use_pallas=True)
    out = jax.block_until_ready(out)

    ref, _, _, _ = layer(x, H, W, use_pallas=False)
    ref = jax.block_until_ready(ref)

    assert out.shape == (B, L, dim), out.shape
    assert (Ho, Wo) == (H, W)
    max_err = float(jnp.max(jnp.abs(out - ref)))
    assert jnp.allclose(out, ref, atol=2e-3, rtol=2e-3), max_err

    print("KERNEL_OK")
</pallas_src>

<mosaic_0001>
module attributes {stable_mosaic.version = 11 : i64} {
  func.func @_ln_linear_kernel(%arg0: i32, %arg1: i32, %arg2: memref<64x32xf32, #tpu.memory_space<vmem>>, %arg3: memref<1x32xf32, #tpu.memory_space<vmem>>, %arg4: memref<1x32xf32, #tpu.memory_space<vmem>>, %arg5: memref<32x128xbf16, #tpu.memory_space<vmem>>, %arg6: memref<1x128xf32, #tpu.memory_space<vmem>>, %arg7: memref<64x128xf32, #tpu.memory_space<vmem>>) attributes {dimension_semantics = [#tpu.dimension_semantics<parallel>, #tpu.dimension_semantics<parallel>], iteration_bounds = array<i64: 2, 1>, scalar_prefetch = 0 : i64, scratch_operands = 0 : i64, tpu.core_type = #tpu.core_type<tc>, window_params = [{transform_indices = @transform_0, window_bounds = array<i64: 64, 32>}, {pipeline_mode = #tpu.pipeline_mode<synchronous>, transform_indices = @transform_1, window_bounds = array<i64: 1, 32>}, {pipeline_mode = #tpu.pipeline_mode<synchronous>, transform_indices = @transform_2, window_bounds = array<i64: 1, 32>}, {transform_indices = @transform_3, window_bounds = array<i64: 32, 128>}, {transform_indices = @transform_4, window_bounds = array<i64: 1, 128>}, {transform_indices = @transform_5, window_bounds = array<i64: 64, 128>}]} {
    %c0 = arith.constant 0 : index
    %c0_0 = arith.constant 0 : index
    %0 = vector.load %arg2[%c0, %c0_0] : memref<64x32xf32, #tpu.memory_space<vmem>>, vector<64x32xf32>
    %cst = arith.constant dense<0.000000e+00> : vector<64xf32>
    %1 = vector.multi_reduction <add>, %0, %cst [1] : vector<64x32xf32> to vector<64xf32>
    %2 = vector.shape_cast %1 : vector<64xf32> to vector<64x1xf32>
    %cst_1 = arith.constant 3.200000e+01 : f32
    %3 = vector.broadcast %cst_1 : f32 to vector<64x1xf32>
    %4 = arith.divf %2, %3 : vector<64x1xf32>
    %5 = vector.broadcast %4 : vector<64x1xf32> to vector<64x32xf32>
    %6 = arith.subf %0, %5 : vector<64x32xf32>
    %7 = arith.mulf %6, %6 : vector<64x32xf32>
    %cst_2 = arith.constant dense<0.000000e+00> : vector<64xf32>
    %8 = vector.multi_reduction <add>, %7, %cst_2 [1] : vector<64x32xf32> to vector<64xf32>
    %9 = vector.shape_cast %8 : vector<64xf32> to vector<64x1xf32>
    %cst_3 = arith.constant 3.200000e+01 : f32
    %10 = vector.broadcast %cst_3 : f32 to vector<64x1xf32>
    %11 = arith.divf %9, %10 : vector<64x1xf32>
    %cst_4 = arith.constant 9.99999974E-6 : f32
    %12 = vector.broadcast %cst_4 : f32 to vector<64x1xf32>
    %13 = arith.addf %11, %12 : vector<64x1xf32>
    %14 = math.rsqrt %13 : vector<64x1xf32>
    %15 = vector.broadcast %14 : vector<64x1xf32> to vector<64x32xf32>
    %16 = arith.mulf %6, %15 : vector<64x32xf32>
    %c0_5 = arith.constant 0 : index
    %c0_6 = arith.constant 0 : index
    %17 = vector.load %arg3[%c0_5, %c0_6] : memref<1x32xf32, #tpu.memory_space<vmem>>, vector<1x32xf32>
    %18 = vector.broadcast %17 : vector<1x32xf32> to vector<64x32xf32>
    %19 = arith.mulf %16, %18 : vector<64x32xf32>
    %c0_7 = arith.constant 0 : index
    %c0_8 = arith.constant 0 : index
    %20 = vector.load %arg4[%c0_7, %c0_8] : memref<1x32xf32, #tpu.memory_space<vmem>>, vector<1x32xf32>
    %21 = vector.broadcast %20 : vector<1x32xf32> to vector<64x32xf32>
    %22 = arith.addf %19, %21 : vector<64x32xf32>
    %23 = arith.truncf %22 : vector<64x32xf32> to vector<64x32xbf16>
    %c0_9 = arith.constant 0 : index
    %c0_10 = arith.constant 0 : index
    %24 = vector.load %arg5[%c0_9, %c0_10] : memref<32x128xbf16, #tpu.memory_space<vmem>>, vector<32x128xbf16>
    %cst_11 = arith.constant dense<0.000000e+00> : vector<64x128xf32>
    %25 = tpu.matmul %23, %24, %cst_11 {dimension_numbers = #tpu.dot_dimension_numbers<[1], [0], [0], [1], [0, 0, 1, 1], [], []>} : vector<64x32xbf16>, vector<32x128xbf16>, vector<64x128xf32> -> vector<64x128xf32>
    %c0_12 = arith.constant 0 : index
    %c0_13 = arith.constant 0 : index
    %26 = vector.load %arg6[%c0_12, %c0_13] : memref<1x128xf32, #tpu.memory_space<vmem>>, vector<1x128xf32>
    %27 = vector.broadcast %26 : vector<1x128xf32> to vector<64x128xf32>
    %28 = arith.addf %25, %27 : vector<64x128xf32>
    %c0_14 = arith.constant 0 : index
    %c0_15 = arith.constant 0 : index
    %29 = vector.load %arg7[%c0_14, %c0_15] : memref<64x128xf32, #tpu.memory_space<vmem>>, vector<64x128xf32>
    tpu.vector_store %arg7[%c0_14, %c0_15], %28 {strides = array<i32>} : memref<64x128xf32, #tpu.memory_space<vmem>>, vector<64x128xf32>,
    return
  }
  func.func @transform_0(%arg0: i32, %arg1: i32) -> (i32, i32) {
    %c0_i32 = arith.constant 0 : i32
    %c0_i32_0 = arith.constant 0 : i32
    return %arg0, %c0_i32 : i32, i32
  }
  func.func @transform_1(%arg0: i32, %arg1: i32) -> (i32, i32) {
    %c0_i32 = arith.constant 0 : i32
    %c0_i32_0 = arith.constant 0 : i32
    %c0_i32_1 = arith.constant 0 : i32
    return %c0_i32, %c0_i32_0 : i32, i32
  }
  func.func @transform_2(%arg0: i32, %arg1: i32) -> (i32, i32) {
    %c0_i32 = arith.constant 0 : i32
    %c0_i32_0 = arith.constant 0 : i32
    %c0_i32_1 = arith.constant 0 : i32
    return %c0_i32, %c0_i32_0 : i32, i32
  }
  func.func @transform_3(%arg0: i32, %arg1: i32) -> (i32, i32) {
    %c0_i32 = arith.constant 0 : i32
    %c0_i32_0 = arith.constant 0 : i32
    return %c0_i32, %arg1 : i32, i32
  }
  func.func @transform_4(%arg0: i32, %arg1: i32) -> (i32, i32) {
    %c0_i32 = arith.constant 0 : i32
    %c0_i32_0 = arith.constant 0 : i32
    return %c0_i32, %arg1 : i32, i32
  }
  func.func @transform_5(%arg0: i32, %arg1: i32) -> (i32, i32) {
    %c0_i32 = arith.constant 0 : i32
    return %arg0, %arg1 : i32, i32
  }
}

</mosaic_0001>

<bundles_post_ra>
// kernel: tpu_custom_call.1
= control target key start
LH: loop header
LB: loop body
LE: loop exit
PB: predicated region body
PF: predicated region fallthrough
CT: control target
= control target key end

     0   :  { %10 = vsyncpa [#allocation3], 0  ;;  %s1070_s0 = inlined_call_operand.vmem [shape: f32[128,32], index: 0, kind: input, shape index: {}]   ;;  %s1071_s1 = inlined_call_operand.vmem [shape: f32[1,32], index: 1, kind: input, shape index: {}]   ;;  %s1072_s2 = inlined_call_operand.vmem [shape: f32[1,32], index: 2, kind: input, shape index: {}]   ;;  %s1073_s3 = inlined_call_operand.vmem [shape: bf16[32,128], index: 3, kind: input, shape index: {}]   ;;  %s1074_s4 = inlined_call_operand.vmem [shape: f32[1,128], index: 4, kind: input, shape index: {}]   ;;  %s1075_s5 = inlined_call_operand.hbm [shape: f32[128,128], index: 5, kind: output, shape index: {}]  }
   0x1   :  { %12 = vsyncpa [#allocation3 + $0x1], 0  ;;  %s877_s18 = smov 0   ;;  %s879_s19 = smov 0  }
   0x2   :  { %s881_s20 = smov 0   ;;  %s883_s21 = smov 0  }
   0x3   :  { %s885_s22 = smov 0   ;;  %s887_s23 = smov 0  }
   0x4 LB: > { %s642_s24 = sadd.s32 4294967295, %s842_s23   ;;  %s643_s25 = sadd.s32 4294967294, %s842_s23   ;;  %s842_s23 = sphi %s887_s23, %s18_s23   ;;  %s838_s22 = sphi %s885_s22, %s1082_s22   ;;  %s834_s21 = sphi %s883_s21, %s1081_s21   ;;  %s830_s20 = sphi %s881_s20, %s1080_s20   ;;  %s826_s19 = sphi %s879_s19, %s1079_s19   ;;  %s822_s18 = sphi %s877_s18, %s1078_s18  }
   0x5   : > { %s30_s26 = sadd.s32 1, %s838_s22  ;;  %s159_s27 = sadd.s32 1, %s830_s20 }
   0x6   : > { %p32_p0 = scmp.ge.s32.totalorder %s30_s26, 2  ;;  %p169_p1 = scmp.ne.s32.totalorder %s830_s20, %s826_s19 }
   0x7   : > { %p170_p2 = scmp.eq.s32.totalorder %s642_s24, 1  ;;  %p175_p3 = scmp.ne.s32.totalorder %s826_s19, %s822_s18 }
   0x8   : > { %s1084_s26 = smov (%p32_p0, %s30_s26), 0  ;;  %p176_p5 = scmp.eq.s32.totalorder %s643_s25, 1 }
   0x9   : > { %p917_p4 = por %p170_p2, %p169_p1  ;;  %s154_s29 = ssub.s32 %s838_s22, %s1084_s26 }
   0xa   : > { %p648_p6 = scmp.ge.s32.totalorder %s842_s23, 1  ;;  %p157_p7 = scmp.eq.s32.totalorder %s154_s29, 0 }
   0xb   : > { %p924_p8 = por %p176_p5, %p175_p3  ;;  %p222_p9 = scmp.lt.s32.totalorder %s842_s23, 3 }
   0xc   : > { %s930_s6 = scalar_select %p157_p7, %s830_s20, %s159_s27  }
   0xd   : > { %p223_p10 = pnand %p648_p6, %p222_p9 }
   0xe   : > { %s650_s7 = sshll.u32 (!%p223_p10), %s834_s21, 3  ;;  %vm280_vm0 = vcmask (!%p223_p10), 261120   ;;  %v746_v56 = vld [vmem:[%s1073_s3] sm:$0xff] (!%p223_p10)   ;;  %v747_v57 = vld [vmem:[%s1073_s3 + $0x8] sm:$0xff] (!%p223_p10)   ;;  %s254_s27 = sand.u32 (!%p223_p10), 1, %s826_s19  }
   0xf   : > { %226 = sbr.rel (%p223_p10) target bundleno = 589 (0x24d), region = 40  ;;  %p258_p11 = scmp.lt.s32.totalorder (!%p223_p10), %s650_s7, 15  ;;  %673 = vmatprep.subr.bf16.mxu0 (!%p223_p10), %v746_v56  ;;  %685 = vmatprep.subr.bf16.mxu1 (!%p223_p10), %v746_v56 }
  0x10   : > { %674 = vmatpush3.bf16.msra.mxu0 (!%p223_p10), %v746_v56  ;;  %687 = vmatpush3.bf16.msra.mxu1 (!%p223_p10), %v746_v56  ;;  %s649_s29 = sshll.u32 (!%p223_p10), %s254_s27, 6  ;;  %s666_s10 = sshll.u32 (!%p223_p10), %s834_s21, 10 }
  0x11   : > { %675 = vmatprep.subr.bf16.mxu0 (!%p223_p10), %v747_v57  ;;  %686 = vmatprep.subr.bf16.mxu1 (!%p223_p10), %v747_v57  ;;  %s256_s9 = scalar_lea.vmem (!%p223_p10), [#allocation2], %s649_s29  ;;  %s1018_s14 = scalar_lea.hbm (!%p223_p10), %s1075_s5, %s666_s10 }
  0x12   : > { %s1024_s21 = scalar_lea.sflag (!%p223_p10), [#allocation3], %s254_s27  ;;  %s844_s16 = smov (!%p223_p10), [#allocation2]  }
  0x13   : > { %s768_s17 = sshll.u32 (!%p223_p10), %s844_s16, 4  ;;  %s769_s17 = int_to_ptr.vmem [resolvable:$false] %s768_s17 }
  0x14   : > { %676 = vmatpush3.bf16.msra.mxu0 (!%p223_p10), %v747_v57  ;;  %688 = vmatpush3.bf16.msra.mxu1 (!%p223_p10), %v747_v57  ;;  %s770_s24 = scalar_lea.vmem (!%p223_p10), %s769_s17, 2048 }
  0x16   : > { %s1086_s7 = smov (!%p258_p11, %s650_s7), 15 }
  0x17   : > { %s651_s8 = sshll.u32 %s1086_s7, 3 }
  0x18   : > { %s261_s11 = scalar_lea.vmem %s1070_s0, %s651_s8 }
  0x19   : > { %v272_v0 = vld [vmem:[%s261_s11] sm:$0xff]  ;;  %v273_v2 = vld [vmem:[%s261_s11 + $0x8] sm:$0xff]  ;;  %v274_v8 = vld [vmem:[%s261_s11 + $0x10] sm:$0xff] }
  0x1a   : > { %v276_v1 = vld [vmem:[%s261_s11 + $0x20] sm:$0xff]  ;;  %v281_v3 = vsel %vm280_vm0, %v272_v0, 0.0  ;;  %v277_v5 = vld [vmem:[%s261_s11 + $0x28] sm:$0xff]  ;;  %v284_v6 = vsel %vm280_vm0, %v273_v2, 0.0  ;;  %v275_v9 = vld [vmem:[%s261_s11 + $0x18] sm:$0xff]  ;;  %v287_v10 = vsel %vm280_vm0, %v274_v8, 0.0 }
  0x1b   : > { %v293_v4 = vsel %vm280_vm0, %v276_v1, 0.0  ;;  %282 = vadd.xlane.f32.xlu0 %v281_v3  ;;  %v296_v7 = vsel %vm280_vm0, %v277_v5, 0.0  ;;  %v290_v11 = vsel %vm280_vm0, %v275_v9, 0.0  ;;  %v278_v12 = vld [vmem:[%s261_s11 + $0x30] sm:$0xff]  ;;  %v279_v13 = vld [vmem:[%s261_s11 + $0x38] sm:$0xff]  ;;  %s543_s11 = sshll.u32 %s256_s9, 4  ;;  %s1020_s11 = int_to_ptr.vmem [resolvable:$true] %s543_s11 }
  0x1c   : > { %294 = vadd.xlane.f32.xlu1 %v293_v4  ;;  %v299_v14 = vsel %vm280_vm0, %v278_v12, 0.0  ;;  %v302_v15 = vsel %vm280_vm0, %v279_v13, 0.0  ;;  %s764_s15 = scalar_lea.vmem %s1020_s11, 1024  ;;  %p771_p1 = scmp.lt.s32.totalorder %s1020_s11, %s769_s17 }
  0x1d   : > { %p765_p12 = scmp.ne.s32.totalorder %s1020_s11, %s764_s15  ;;  %p772_p2 = scmp.lt.s32.totalorder %s770_s24, %s764_s15 }
  0x1f   : > { %285 = vadd.xlane.f32.xlu0 %v284_v6  ;;  %p766_p13 = pnand %p765_p12, %p917_p4  ;;  %p773_p3 = por %p772_p2, %p771_p1 }
  0x20   : > { %297 = vadd.xlane.f32.xlu1 %v296_v7 }
  0x21   : > { %p767_p0 = pneg %p766_p13 }
  0x23   : > { %288 = vadd.xlane.f32.xlu0 %v287_v10  ;;  %p774_p5 = pnand %p773_p3, %p767_p0 }
  0x24   : > { %291 = vadd.xlane.f32.xlu1 %v290_v11 }
  0x27   : > { %300 = vadd.xlane.f32.xlu0 %v299_v14 }
  0x28   : > { %303 = vadd.xlane.f32.xlu1 %v302_v15 }
  0xa8   : > { %v283_v16 = vpop.xlane.xlu0 %282 }
  0xa9   : > { %v295_v17 = vpop.xlane.xlu1 %294  ;;  %v306_v18 = vmul.f32 0.03125, %v283_v16 }
  0xaa   : > { %v310_v19 = vmul.f32 0.03125, %v295_v17 }
  0xab   : > { %v944_v20 = vsub.f32 %v272_v0, %v306_v18 }
  0xac   : > { %v946_v21 = vsub.f32 %v276_v1, %v310_v19  ;;  %v286_v22 = vpop.xlane.xlu0 %285  ;;  %v652_v19 = vld [vmem:[%s1071_s1] ss:$0 sm:$0xff] }
  0xad   : > { %v298_v23 = vpop.xlane.xlu1 %297  ;;  %v307_v24 = vmul.f32 0.03125, %v286_v22  ;;  %v322_v26 = vmul.f32 %v944_v20, %v944_v20 }
  0xae   : > { %v311_v25 = vmul.f32 0.03125, %v298_v23  ;;  %v326_v27 = vmul.f32 %v946_v21, %v946_v21 }
  0xaf   : > { %v952_v28 = vsub.f32 %v273_v2, %v307_v24  ;;  %v330_v30 = vsel %vm280_vm0, %v322_v26, 0.0 }
  0xb0   : > { %v954_v29 = vsub.f32 %v277_v5, %v311_v25  ;;  %331 = vadd.xlane.f32.xlu0 %v330_v30  ;;  %v289_v31 = vpop.xlane.xlu0 %288  ;;  %v342_v33 = vsel %vm280_vm0, %v326_v27, 0.0  ;;  %v653_v27 = vld [vmem:[%s1072_s2] ss:$0 sm:$0xff] }
  0xb1   : > { %v292_v32 = vpop.xlane.xlu1 %291  ;;  %v308_v34 = vmul.f32 0.03125, %v289_v31  ;;  %v323_v36 = vmul.f32 %v952_v28, %v952_v28 }
  0xb2   : > { %v309_v35 = vmul.f32 0.03125, %v292_v32  ;;  %v327_v37 = vmul.f32 %v954_v29, %v954_v29 }
  0xb3   : > { %v962_v38 = vsub.f32 %v274_v8, %v308_v34  ;;  %v333_v40 = vsel %vm280_vm0, %v323_v36, 0.0 }
  0xb4   : > { %v964_v39 = vsub.f32 %v275_v9, %v309_v35  ;;  %343 = vadd.xlane.f32.xlu0 %v342_v33  ;;  %334 = vadd.xlane.f32.xlu1 %v333_v40  ;;  %v301_v41 = vpop.xlane.xlu0 %300  ;;  %v345_v43 = vsel %vm280_vm0, %v327_v37, 0.0 }
  0xb5   : > { %v304_v42 = vpop.xlane.xlu1 %303  ;;  %v312_v44 = vmul.f32 0.03125, %v301_v41  ;;  %v324_v46 = vmul.f32 %v962_v38, %v962_v38 }
  0xb6   : > { %v313_v45 = vmul.f32 0.03125, %v304_v42  ;;  %v325_v47 = vmul.f32 %v964_v39, %v964_v39 }
  0xb7   : > { %v972_v48 = vsub.f32 %v278_v12, %v312_v44  ;;  %v336_v50 = vsel %vm280_vm0, %v324_v46, 0.0 }
  0xb8   : > { %v974_v49 = vsub.f32 %v279_v13, %v313_v45  ;;  %346 = vadd.xlane.f32.xlu1 %v345_v43  ;;  %337 = vadd.xlane.f32.xlu0 %v336_v50  ;;  %v339_v51 = vsel %vm280_vm0, %v325_v47, 0.0 }
  0xb9   : > { %v328_v52 = vmul.f32 %v972_v48, %v972_v48 }
  0xba   : > { %v329_v53 = vmul.f32 %v974_v49, %v974_v49 }
  0xbb   : > { %v348_v54 = vsel %vm280_vm0, %v328_v52, 0.0 }
  0xbc   : > { %340 = vadd.xlane.f32.xlu1 %v339_v51  ;;  %349 = vadd.xlane.f32.xlu0 %v348_v54  ;;  %v351_v55 = vsel %vm280_vm0, %v329_v53, 0.0 }
  0xc0   : > { %352 = vadd.xlane.f32.xlu1 %v351_v55 }
 0x13d   : > { %v332_v58 = vpop.xlane.xlu0 %331 }
 0x13e   : > { %v354_v59 = vmul.f32 0.03125, %v332_v58 }
 0x140   : > { %v362_v60 = vadd.f32 1e-05, %v354_v59 }
 0x141   : > { %v335_v61 = vpop.xlane.xlu1 %334  ;;  %v344_v62 = vpop.xlane.xlu0 %343 }
 0x142   : > { %748 = vrsqrt.f32 %v362_v60  ;;  %v355_v63 = vmul.f32 0.03125, %v335_v61  ;;  %v358_v0 = vmul.f32 0.03125, %v344_v62 }
 0x144   : > { %v363_v1 = vadd.f32 1e-05, %v355_v63  ;;  %v366_v2 = vadd.f32 1e-05, %v358_v0 }
 0x145   : > { %v347_v3 = vpop.xlane.xlu1 %346  ;;  %v338_v4 = vpop.xlane.xlu0 %337 }
 0x146   : > { %750 = vrsqrt.f32 %v363_v1  ;;  %v359_v5 = vmul.f32 0.03125, %v347_v3  ;;  %v356_v6 = vmul.f32 0.03125, %v338_v4 }
 0x147   : > { %752 = vrsqrt.f32 %v366_v2 }
 0x148   : > { %v367_v7 = vadd.f32 1e-05, %v359_v5  ;;  %v364_v8 = vadd.f32 1e-05, %v356_v6 }
 0x149   : > { %v341_v9 = vpop.xlane.xlu1 %340  ;;  %v350_v10 = vpop.xlane.xlu0 %349 }
 0x14a   : > { %754 = vrsqrt.f32 %v367_v7  ;;  %v357_v11 = vmul.f32 0.03125, %v341_v9  ;;  %v360_v12 = vmul.f32 0.03125, %v350_v10 }
 0x14b   : > { %756 = vrsqrt.f32 %v364_v8 }
 0x14c   : > { %v749_v13 = vpop.eup %748  ;;  %v365_v14 = vadd.f32 1e-05, %v357_v11  ;;  %v368_v15 = vadd.f32 1e-05, %v360_v12 }
 0x14d   : > { %v353_v16 = vpop.xlane.xlu1 %352  ;;  %v378_v17 = vmul.f32 %v749_v13, %v944_v20 }
 0x14e   : > { %758 = vrsqrt.f32 %v365_v14  ;;  %v361_v18 = vmul.f32 0.03125, %v353_v16 }
 0x14f   : > { %760 = vrsqrt.f32 %v368_v15  ;;  %v393_v26 = vmul.f32 %v652_v19, %v378_v17 }
 0x150   : > { %v751_v22 = vpop.eup %750  ;;  %v369_v23 = vadd.f32 1e-05, %v361_v18 }
 0x151   : > { %v753_v24 = vpop.eup %752  ;;  %v379_v25 = vmul.f32 %v751_v22, %v952_v28  ;;  %v408_v33 = vadd.f32 %v653_v27, %v393_v26 }
 0x152   : > { %762 = vrsqrt.f32 %v369_v23  ;;  %v382_v20 = vmul.f32 %v753_v24, %v946_v21 }
 0x153   : > { %v394_v30 = vmul.f32 %v652_v19, %v379_v25 }
 0x154   : > { %v755_v31 = vpop.eup %754  ;;  %v397_v36 = vmul.f32 %v652_v19, %v382_v20 }
 0x155   : > { %v757_v32 = vpop.eup %756  ;;  %v409_v34 = vadd.f32 %v653_v27, %v394_v30  ;;  %v383_v35 = vmul.f32 %v755_v31, %v954_v29 }
 0x156   : > { %v380_v37 = vmul.f32 %v757_v32, %v962_v38  ;;  %v412_v44 = vadd.f32 %v653_v27, %v397_v36 }
 0x157   : > { %v416_v40 = vpack.c.bf16 %v409_v34, %v408_v33  ;;  %v398_v28 = vmul.f32 %v652_v19, %v383_v35 }
 0x158   : > { %v759_v41 = vpop.eup %758  ;;  %v395_v45 = vmul.f32 %v652_v19, %v380_v37 }
 0x159   : > { %v761_v42 = vpop.eup %760  ;;  %v381_v43 = vmul.f32 %v759_v41, %v964_v39  ;;  %677 = vmatprep.mubr.msk.bf16.mxu0 %vm280_vm0, %v416_v40  ;;  %v413_v21 = vadd.f32 %v653_v27, %v398_v28 }
 0x15a   : > { %v384_v46 = vmul.f32 %v761_v42, %v972_v48  ;;  %v410_v51 = vadd.f32 %v653_v27, %v395_v45  ;;  %v654_v48 = vld [vmem:[%s1074_s4] ss:$0 sm:$0xff] }
 0x15b   : > { %v418_v47 = vpack.c.bf16 %v413_v21, %v412_v44  ;;  %v396_v29 = vmul.f32 %v652_v19, %v381_v43 }
 0x15c   : > { %v763_v50 = vpop.eup %762  ;;  %v399_v53 = vmul.f32 %v652_v19, %v384_v46 }
 0x15d   : > { %v385_v38 = vmul.f32 %v763_v50, %v974_v49  ;;  %681 = vmatprep.mubr.msk.bf16.mxu1 %vm280_vm0, %v418_v47  ;;  %v411_v52 = vadd.f32 %v653_v27, %v396_v29 }
 0x15e   : > { %v414_v55 = vadd.f32 %v653_v27, %v399_v53 }
 0x15f   : > { %v417_v39 = vpack.c.bf16 %v411_v52, %v410_v51  ;;  %v400_v54 = vmul.f32 %v652_v19, %v385_v38 }
 0x161   : > { %678 = vmatmul.mubr.msk.bf16.vlgmr.msra.gmra.mrb[0].mxu0 %vm280_vm0, %v417_v39  ;;  %v415_v56 = vadd.f32 %v653_v27, %v400_v54 }
 0x163   : > { %v419_v57 = vpack.c.bf16 %v415_v56, %v414_v55 }
 0x165   : > { %682 = vmatmul.mubr.msk.bf16.vlgmr.msra.gmra.mrb[0].mxu1 %vm280_vm0, %v419_v57 }
 0x234   : > { %v679_v49 = vpop.f32.mrb[0].mxu0 }
 0x235   : > { %v498_v58 = vadd.f32 %v679_v49, %v654_v48  ;;  %v489_v59 = vpop.f32.mrb[1].mxu0 }
 0x236   : > { %v490_v60 = vadd.f32 %v654_v48, %v489_v59  ;;  %v680_v61 = vpop.f32.mrb[2].mxu0 }
 0x237   : > { %522 = vst [vmem:[%s256_s9 + $0x10] sm:$0xff] %v498_v58  ;;  %v501_v62 = vadd.f32 %v680_v61, %v654_v48  ;;  %v492_v63 = vpop.f32.mrb[3].mxu0 }
 0x238   : > { %520 = vst [vmem:[%s256_s9] sm:$0xff] %v490_v60  ;;  %v493_v0 = vadd.f32 %v654_v48, %v492_v63  ;;  %v683_v1 = vpop.f32.mrb[0].mxu1 }
 0x239   : > { %523 = vst [vmem:[%s256_s9 + $0x18] sm:$0xff] %v501_v62  ;;  %v514_v2 = vadd.f32 %v683_v1, %v654_v48  ;;  %v505_v3 = vpop.f32.mrb[1].mxu1 }
 0x23a   : > { %521 = vst [vmem:[%s256_s9 + $0x8] sm:$0xff] %v493_v0  ;;  %v506_v4 = vadd.f32 %v654_v48, %v505_v3  ;;  %v684_v5 = vpop.f32.mrb[2].mxu1 }
 0x23b   : > { %526 = vst [vmem:[%s256_s9 + $0x30] sm:$0xff] %v514_v2  ;;  %v517_v6 = vadd.f32 %v684_v5, %v654_v48  ;;  %v508_v7 = vpop.f32.mrb[3].mxu1 }
 0x23c   : > { %524 = vst [vmem:[%s256_s9 + $0x20] sm:$0xff] %v506_v4  ;;  %v509_v8 = vadd.f32 %v654_v48, %v508_v7 }
 0x23d   : > { %527 = vst [vmem:[%s256_s9 + $0x38] sm:$0xff] %v517_v6 }
 0x23e   : > { %525 = vst [vmem:[%s256_s9 + $0x28] sm:$0xff] %v509_v8 }
 0x23f   : > { %777 = shalt.err (!%p774_p5)
}
 0x240   : > { %s778_s25 = scalar_lea.hbm %s1018_s14, 1024  ;;  %s782_s7 = scalar_lea.hbm %s1075_s5, 2048 }
 0x241   : > { %p779_p6 = scmp.ne.s32.totalorder %s1018_s14, %s778_s25  ;;  %p783_p10 = scmp.lt.u32.totalorder %s1018_s14, %s1075_s5 }
 0x242   : > { %p784_p11 = scmp.lt.u32.totalorder %s782_s7, %s778_s25  ;;  %p786_p13 = scmp.lt.u32.totalorder %s778_s25, %s1018_s14 }
 0x243   : > { %p780_p7 = pnand %p779_p6, %p917_p4 }
 0x244   : > { %p785_p12 = por %p784_p11, %p783_p10 }
 0x245   : > { %p781_p9 = pneg %p780_p7 }
 0x246   : > { %p787_p0 = por %p786_p13, %p785_p12 }
 0x248   : > { %p788_p1 = pnand %p787_p0, %p781_p9 }
 0x24a   : > { %791 = shalt.err (!%p788_p1)
}
 0x24b   : > { %s845_s10 = smov 128   ;;  %s846_s12 = smov 8  }
 0x24c   : > { %689 = dma.vmem_to_hbm [thread:$0]  (%p917_p4), %s1020_s11, 1024, %s1018_s14, %s1024_s21, %s845_s10, %s845_s10, %s846_s12  }
 0x24d PF: > { %p695_p2 = scmp.ge.s32.totalorder %s842_s23, 2  ;;  %s558_s13 = sand.u32 1, %s822_s18  }
 0x24e   : > { %s559_s15 = scalar_lea.sflag [#allocation3], %s558_s13 }
 0x24f   : > { %p692_p3 = pnand %p695_p2, %p924_p8 }
 0x251   : > { %817 = dma.done.wait (!%p692_p3), %s559_s15, 1024  }
 0x252   : > { %819 = vsyncadd (!%p692_p3), %s559_s15, 4294966272  ;;  %s18_s23 = sadd.s32 1, %s842_s23   ;;  %s1078_s18 = smov %s826_s19 }
 0x253   : > { %p15_p5 = scmp.ge.s32.totalorder %s18_s23, 4   ;;  %s1079_s19 = smov %s830_s20 }
 0x254   : > { %s1080_s20 = smov %s930_s6  ;;  %s1081_s21 = smov %s838_s22 }
 0x255   : > { %s1082_s22 = smov %s1084_s26  ;;  %17 = sbr.rel (!%p15_p5) target bundleno = 4 (0x4), region = 81 }
 0x25c   :  { %564 = vsyncpa [#allocation3], 1 }
 0x25d   :  { %566 = vsyncpa [#allocation3 + $0x1], 1 }

</bundles_post_ra>
